<compile_context>
chip_gen: v7x
topology: tpu7x:2x2x1
jax: 0.10.0
libtpu: 0.0.40
codegen_flags: <defaults>
</compile_context>

<pallas_src>
import jax
import jax.numpy as jnp
from jax.experimental import pallas as pl
from jax.experimental.pallas import tpu as pltpu


# ------------------------------------------------------------------
# JAX glue: PointRend point_sample == F.grid_sample(img, 2*points-1,
# align_corners=False, padding_mode='zeros') for points in [0, 1]^2.
# Gather + bilinear blend are expressed directly (XLA fuses them), so no
# (B, 4, C, N) corner tensor is ever materialized.
# NOTE (perf review #7): a channels-last gather layout may DMA better for very large
# feature maps; left as-is here because transposing res2/out costs a full pass itself
# and N << H*W in typical PointRend training.
# ------------------------------------------------------------------
def point_sample(img, points):
    """img: (B, C, H, W); points: (B, N, 2) with (x, y) in [0, 1]. Returns (B, C, N)."""
    B, C, H, W = img.shape
    gx = 2.0 * points[..., 0] - 1.0  # (B, N)
    gy = 2.0 * points[..., 1] - 1.0
    # align_corners=False unnormalization
    fx = ((gx + 1.0) * W - 1.0) * 0.5
    fy = ((gy + 1.0) * H - 1.0) * 0.5
    x0 = jnp.floor(fx)
    y0 = jnp.floor(fy)
    x1 = x0 + 1.0
    y1 = y0 + 1.0
    wx = fx - x0
    wy = fy - y0

    flat = img.reshape(B, C, H * W)

    def corner(yi, xi, w):
        valid = (xi >= 0) & (xi <= W - 1) & (yi >= 0) & (yi <= H - 1)
        w = w * valid.astype(img.dtype)                       # padding_mode='zeros'
        xii = jnp.clip(xi, 0, W - 1).astype(jnp.int32)
        yii = jnp.clip(yi, 0, H - 1).astype(jnp.int32)
        idx = (yii * W + xii)[:, None, :]                     # (B, 1, N)
        idx = jnp.broadcast_to(idx, (B, C, idx.shape[-1]))    # (B, C, N)
        g = jnp.take_along_axis(flat, idx, axis=2)            # (B, C, N)
        return g * w[:, None, :]

    return (corner(y0, x0, (1.0 - wy) * (1.0 - wx))
            + corner(y0, x1, (1.0 - wy) * wx)
            + corner(y1, x0, wy * (1.0 - wx))
            + corner(y1, x1, wy * wx))


def sampling_points_train(key, out, N, k, beta):
    """PointRend sampling_points, training branch (rand over-generation + top-k uncertainty)."""
    B, C, H, W = out.shape
    kN = k * N
    n_imp = int(beta * N)
    key_over, key_cov = jax.random.split(key)
    over = jax.random.uniform(key_over, (B, kN, 2), dtype=out.dtype)
    mask_sorted = jnp.sort(out, axis=1)[:, ::-1]              # sort channels descending
    over_map = point_sample(mask_sorted, over)                # (B, C, kN)
    uncertainty = -(over_map[:, 0] - over_map[:, 1])          # (B, kN)
    _, idx = jax.lax.top_k(uncertainty, n_imp)                # (B, n_imp)
    idx3 = jnp.broadcast_to(idx[:, :, None], (B, n_imp, 2))
    importance = jnp.take_along_axis(over, idx3, axis=1)      # (B, n_imp, 2)
    coverage = jax.random.uniform(key_cov, (B, N - n_imp, 2), dtype=out.dtype)
    return jnp.concatenate([importance, coverage], axis=1)    # (B, N, 2)


# ------------------------------------------------------------------
# Pallas kernel: split-K 1x1-conv matmul on the natural (B, C, N) layout.
#   wc_ref     : (nc, C_coarse)        weights for the coarse (logit) channels
#   wf_ref     : (nc, C_fine)          weights for the fine (res2) channels
#   b_ref      : (nc, 1)   f32         bias
#   coarse_ref : (1, C_coarse, TILE)   per-batch coarse features for TILE points
#   fine_ref   : (1, C_fine,   TILE)   per-batch fine features for TILE points
#   rend_ref   : (1, nc, TILE)  f32
# ------------------------------------------------------------------
def point_head_mlp_kernel(wc_ref, wf_ref, b_ref, coarse_ref, fine_ref, rend_ref):
    acc = jnp.dot(wc_ref[...], coarse_ref[0], preferred_element_type=jnp.float32)
    acc = acc + jnp.dot(wf_ref[...], fine_ref[0], preferred_element_type=jnp.float32)
    rend_ref[0] = (acc + b_ref[...]).astype(rend_ref.dtype)


def _lane_tiling(N, B, lane_tile):
    """Pick (tile_n, num_tiles, N_pad) for the point axis."""
    lane_tile = max(128, (int(lane_tile) // 128) * 128)
    # v7x has two TensorCores; both grid axes are "parallel", so B >= 2 already feeds
    # both cores. Only force an N split when B == 1 (and N is big enough to matter).
    min_tiles = 2 if (B == 1 and N >= 256) else 1
    num_tiles = max(min_tiles, pl.cdiv(N, lane_tile))
    if num_tiles == 1:
        return N, 1, N                                    # single full-extent block, no pad
    tile_n = pl.cdiv(pl.cdiv(N, num_tiles), 128) * 128    # derived from count: no overshoot
    return tile_n, num_tiles, num_tiles * tile_n


def point_head_forward(params, x, res2, out, key, k=3, beta=0.75,
                       lane_tile=4096, mxu_dtype=jnp.bfloat16):
    """Training forward: returns {'rend': (B, num_classes, N), 'points': (B, N, 2)}."""
    N = x.shape[-1] * 4
    points = sampling_points_train(key, out, N, k, beta)

    compute_dtype = out.dtype if mxu_dtype is None else mxu_dtype
    # Gather + bilinear blend in glue (XLA fuses gather+mul+add+cast) -> only the two
    # natural (B, C, N) tensors the kernel reads; no packed slab in HBM.
    coarse = point_sample(out, points).astype(compute_dtype)   # (B, nc,     N)
    fine = point_sample(res2, points).astype(compute_dtype)    # (B, C_fine, N)

    B, C_coarse, _ = coarse.shape
    C_fine = fine.shape[1]
    nc = params["w"].shape[0]

    # Split the Conv1d weight to match cat([coarse, fine], dim=1); bias stays f32.
    w_coarse = params["w"][:, :C_coarse].astype(compute_dtype)  # (nc, C_coarse)
    w_fine = params["w"][:, C_coarse:].astype(compute_dtype)    # (nc, C_fine)
    bias = params["b"].reshape(nc, 1).astype(jnp.float32)       # (nc, 1)

    tile_n, num_tiles, N_pad = _lane_tiling(N, B, lane_tile)
    if N_pad != N:
        pad = ((0, 0), (0, 0), (0, N_pad - N))
        coarse = jnp.pad(coarse, pad)
        fine = jnp.pad(fine, pad)

    rend = pl.pallas_call(
        point_head_mlp_kernel,
        out_shape=jax.ShapeDtypeStruct((B, nc, N_pad), jnp.float32),
        grid=(B, num_tiles),
        in_specs=[
            pl.BlockSpec((nc, C_coarse), lambda b, t: (0, 0)),        # W_coarse resident
            pl.BlockSpec((nc, C_fine), lambda b, t: (0, 0)),          # W_fine resident
            pl.BlockSpec((nc, 1), lambda b, t: (0, 0)),               # bias resident
            pl.BlockSpec((1, C_coarse, tile_n), lambda b, t: (b, 0, t)),
            pl.BlockSpec((1, C_fine, tile_n), lambda b, t: (b, 0, t)),
        ],
        out_specs=pl.BlockSpec((1, nc, tile_n), lambda b, t: (b, 0, t)),
        compiler_params=pltpu.CompilerParams(
            dimension_semantics=("parallel", "parallel"),   # shards (B, N-tiles) across TCs
        ),
    )(w_coarse, w_fine, bias, coarse, fine)

    if N_pad != N:
        # Padded lanes hold bias-only values — never consume them.
        rend = rend[:, :, :N]
    return {"rend": rend, "points": points}


if __name__ == "__main__":
    # Small shapes consistent with the module:
    #   num_classes = 2 (channels of `out`), in_c = 32  =>  res2 has 30 channels.
    num_classes = 2
    in_c = 32
    C_res2 = in_c - num_classes

    key = jax.random.PRNGKey(0)
    kx, kr, ko, kw, kb, ks = jax.random.split(key, 6)

    x = jax.random.normal(kx, (2, 3, 16, 16), jnp.float32)        # only x.shape[-1] is used
    res2 = jax.random.normal(kr, (2, C_res2, 16, 16), jnp.float32)
    out = jax.random.normal(ko, (2, num_classes, 8, 8), jnp.float32)

    params = {
        "w": jax.random.normal(kw, (num_classes, in_c), jnp.float32) * 0.05,
        "b": jax.random.normal(kb, (num_classes,), jnp.float32) * 0.05,
    }

    result = point_head_forward(params, x, res2, out, ks, k=3, beta=0.75)
    rend = jax.block_until_ready(result["rend"])
    points = jax.block_until_ready(result["points"])

    # Pure-JAX f32 reference of the same forward (for sanity).
    coarse_ref = point_sample(out, points)
    fine_ref = point_sample(res2, points)
    feat_ref = jnp.concatenate([coarse_ref, fine_ref], axis=1)    # (B, in_c, N)
    rend_ref = jnp.einsum("oc,bcn->bon", params["w"], feat_ref) + params["b"][None, :, None]

    N = x.shape[-1] * 4
    assert rend.shape == (2, num_classes, N)
    assert points.shape == (2, N, 2)
    # Operands are bf16 by default (f32 accumulation) -> loose tolerance vs f32 reference.
    assert jnp.allclose(rend, rend_ref, atol=2e-2, rtol=2e-2), "Pallas output mismatch"

    print("KERNEL_OK")
</pallas_src>

<mosaic_0001>
module attributes {stable_mosaic.version = 11 : i64} {
  func.func @point_head_mlp_kernel(%arg0: i32, %arg1: i32, %arg2: memref<2x2xbf16, #tpu.memory_space<vmem>>, %arg3: memref<2x30xbf16, #tpu.memory_space<vmem>>, %arg4: memref<2x1xf32, #tpu.memory_space<vmem>>, %arg5: memref<1x2x64xbf16, #tpu.memory_space<vmem>>, %arg6: memref<1x30x64xbf16, #tpu.memory_space<vmem>>, %arg7: memref<1x2x64xf32, #tpu.memory_space<vmem>>) attributes {dimension_semantics = [#tpu.dimension_semantics<parallel>, #tpu.dimension_semantics<parallel>], iteration_bounds = array<i64: 2, 1>, scalar_prefetch = 0 : i64, scratch_operands = 0 : i64, tpu.core_type = #tpu.core_type<tc>, window_params = [{pipeline_mode = #tpu.pipeline_mode<synchronous>, transform_indices = @transform_0, window_bounds = array<i64: 2, 2>}, {pipeline_mode = #tpu.pipeline_mode<synchronous>, transform_indices = @transform_1, window_bounds = array<i64: 2, 30>}, {pipeline_mode = #tpu.pipeline_mode<synchronous>, transform_indices = @transform_2, window_bounds = array<i64: 2, 1>}, {transform_indices = @transform_3, window_bounds = array<i64: 1, 2, 64>}, {transform_indices = @transform_4, window_bounds = array<i64: 1, 30, 64>}, {transform_indices = @transform_5, window_bounds = array<i64: 1, 2, 64>}]} {
    %c0 = arith.constant 0 : index
    %c0_0 = arith.constant 0 : index
    %0 = vector.load %arg2[%c0, %c0_0] : memref<2x2xbf16, #tpu.memory_space<vmem>>, vector<2x2xbf16>
    %c0_1 = arith.constant 0 : index
    %c0_2 = arith.constant 0 : index
    %c0_3 = arith.constant 0 : index
    %1 = vector.load %arg5[%c0_1, %c0_2, %c0_3] : memref<1x2x64xbf16, #tpu.memory_space<vmem>>, vector<1x2x64xbf16>
    %2 = vector.shape_cast %1 : vector<1x2x64xbf16> to vector<2x64xbf16>
    %cst = arith.constant dense<0.000000e+00> : vector<2x64xf32>
    %3 = tpu.matmul %0, %2, %cst {dimension_numbers = #tpu.dot_dimension_numbers<[1], [0], [0], [1], [0, 0, 1, 1], [], []>} : vector<2x2xbf16>, vector<2x64xbf16>, vector<2x64xf32> -> vector<2x64xf32>
    %c0_4 = arith.constant 0 : index
    %c0_5 = arith.constant 0 : index
    %4 = vector.load %arg3[%c0_4, %c0_5] : memref<2x30xbf16, #tpu.memory_space<vmem>>, vector<2x30xbf16>
    %c0_6 = arith.constant 0 : index
    %c0_7 = arith.constant 0 : index
    %c0_8 = arith.constant 0 : index
    %5 = vector.load %arg6[%c0_6, %c0_7, %c0_8] : memref<1x30x64xbf16, #tpu.memory_space<vmem>>, vector<1x30x64xbf16>
    %6 = vector.shape_cast %5 : vector<1x30x64xbf16> to vector<30x64xbf16>
    %cst_9 = arith.constant dense<0.000000e+00> : vector<2x64xf32>
    %7 = tpu.matmul %4, %6, %cst_9 {dimension_numbers = #tpu.dot_dimension_numbers<[1], [0], [0], [1], [0, 0, 1, 1], [], []>} : vector<2x30xbf16>, vector<30x64xbf16>, vector<2x64xf32> -> vector<2x64xf32>
    %8 = arith.addf %3, %7 : vector<2x64xf32>
    %c0_10 = arith.constant 0 : index
    %c0_11 = arith.constant 0 : index
    %9 = vector.load %arg4[%c0_10, %c0_11] : memref<2x1xf32, #tpu.memory_space<vmem>>, vector<2x1xf32>
    %10 = vector.broadcast %9 : vector<2x1xf32> to vector<2x64xf32>
    %11 = arith.addf %8, %10 : vector<2x64xf32>
    %c0_12 = arith.constant 0 : index
    %c0_13 = arith.constant 0 : index
    %c0_14 = arith.constant 0 : index
    %12 = vector.load %arg7[%c0_12, %c0_13, %c0_14] : memref<1x2x64xf32, #tpu.memory_space<vmem>>, vector<1x2x64xf32>
    %13 = vector.shape_cast %12 : vector<1x2x64xf32> to vector<2x64xf32>
    %14 = vector.shape_cast %11 : vector<2x64xf32> to vector<1x2x64xf32>
    tpu.vector_store %arg7[%c0_12, %c0_13, %c0_14], %14 {strides = array<i32>} : memref<1x2x64xf32, #tpu.memory_space<vmem>>, vector<1x2x64xf32>,
    return
  }
  func.func @transform_0(%arg0: i32, %arg1: i32) -> (i32, i32) {
    %c0_i32 = arith.constant 0 : i32
    %c0_i32_0 = arith.constant 0 : i32
    %c0_i32_1 = arith.constant 0 : i32
    return %c0_i32, %c0_i32_0 : i32, i32
  }
  func.func @transform_1(%arg0: i32, %arg1: i32) -> (i32, i32) {
    %c0_i32 = arith.constant 0 : i32
    %c0_i32_0 = arith.constant 0 : i32
    %c0_i32_1 = arith.constant 0 : i32
    return %c0_i32, %c0_i32_0 : i32, i32
  }
  func.func @transform_2(%arg0: i32, %arg1: i32) -> (i32, i32) {
    %c0_i32 = arith.constant 0 : i32
    %c0_i32_0 = arith.constant 0 : i32
    %c0_i32_1 = arith.constant 0 : i32
    return %c0_i32, %c0_i32_0 : i32, i32
  }
  func.func @transform_3(%arg0: i32, %arg1: i32) -> (i32, i32, i32) {
    %c0_i32 = arith.constant 0 : i32
    %c0_i32_0 = arith.constant 0 : i32
    return %arg0, %c0_i32, %arg1 : i32, i32, i32
  }
  func.func @transform_4(%arg0: i32, %arg1: i32) -> (i32, i32, i32) {
    %c0_i32 = arith.constant 0 : i32
    %c0_i32_0 = arith.constant 0 : i32
    return %arg0, %c0_i32, %arg1 : i32, i32, i32
  }
  func.func @transform_5(%arg0: i32, %arg1: i32) -> (i32, i32, i32) {
    %c0_i32 = arith.constant 0 : i32
    %c0_i32_0 = arith.constant 0 : i32
    return %arg0, %c0_i32, %arg1 : i32, i32, i32
  }
}

</mosaic_0001>

<bundles_post_ra>
// kernel: tpu_custom_call.1
= control target key start
LH: loop header
LB: loop body
LE: loop exit
PB: predicated region body
PF: predicated region fallthrough
CT: control target
= control target key end

     0   :  { %10 = vsyncpa [#allocation3], 0  ;;  %s833_s0 = inlined_call_operand.vmem [shape: bf16[2,2], index: 0, kind: input, shape index: {}]   ;;  %s834_s1 = inlined_call_operand.vmem [shape: bf16[2,30], index: 1, kind: input, shape index: {}]   ;;  %s835_s2 = inlined_call_operand.vmem [shape: f32[2,1], index: 2, kind: input, shape index: {}]   ;;  %s836_s3 = inlined_call_operand.vmem [shape: bf16[2,2,64], index: 3, kind: input, shape index: {}]   ;;  %s837_s4 = inlined_call_operand.vmem [shape: bf16[2,30,64], index: 4, kind: input, shape index: {}]   ;;  %s838_s5 = inlined_call_operand.hbm [shape: f32[2,2,64], index: 5, kind: output, shape index: {}]  }
   0x1   :  { %12 = vsyncpa [#allocation3 + $0x1], 0  ;;  %s709_s18 = smov 0   ;;  %s711_s19 = smov 0  }
   0x2   :  { %s713_s20 = smov 0   ;;  %s715_s21 = smov 0  }
   0x3   :  { %s717_s22 = smov 0   ;;  %s719_s23 = smov 0  }
   0x4 LB: > { %s498_s24 = sadd.s32 4294967295, %s673_s23   ;;  %s499_s25 = sadd.s32 4294967294, %s673_s23   ;;  %s673_s23 = sphi %s719_s23, %s18_s23   ;;  %s669_s22 = sphi %s717_s22, %s845_s22   ;;  %s665_s21 = sphi %s715_s21, %s844_s21   ;;  %s661_s20 = sphi %s713_s20, %s843_s20   ;;  %s657_s19 = sphi %s711_s19, %s842_s19   ;;  %s653_s18 = sphi %s709_s18, %s841_s18  }
   0x5   : > { %s30_s26 = sadd.s32 1, %s669_s22  ;;  %s158_s27 = sadd.s32 1, %s661_s20 }
   0x6   : > { %p32_p0 = scmp.ge.s32.totalorder %s30_s26, 2  ;;  %p168_p1 = scmp.ne.s32.totalorder %s661_s20, %s657_s19 }
   0x7   : > { %p169_p2 = scmp.eq.s32.totalorder %s498_s24, 1  ;;  %p174_p3 = scmp.ne.s32.totalorder %s657_s19, %s653_s18 }
   0x8   : > { %s847_s26 = smov (%p32_p0, %s30_s26), 0  ;;  %p175_p5 = scmp.eq.s32.totalorder %s499_s25, 1 }
   0x9   : > { %p749_p4 = por %p169_p2, %p168_p1  ;;  %s153_s29 = ssub.s32 %s669_s22, %s847_s26 }
   0xa   : > { %p502_p6 = scmp.ge.s32.totalorder %s673_s23, 1  ;;  %p156_p7 = scmp.eq.s32.totalorder %s153_s29, 0 }
   0xb   : > { %p756_p8 = por %p175_p5, %p174_p3  ;;  %p222_p9 = scmp.lt.s32.totalorder %s673_s23, 3 }
   0xc   : > { %s762_s6 = scalar_select %p156_p7, %s661_s20, %s158_s27  }
   0xd   : > { %p223_p10 = pnand %p502_p6, %p222_p9 }
   0xe   : > { %p259_p11 = scmp.lt.s32.totalorder (!%p223_p10), %s665_s21, 1  ;;  %v675_v0 = vmov (!%p223_p10), 0.0   ;;  %vm676_vm0 = vmmov (!%p223_p10), 0   ;;  %v388_v1 = vld [vmem:[%s835_s2] sm:$0x3] (!%p223_p10)  ;;  %vm344_vm1 = vcmask (!%p223_p10), 1040384  }
   0xf   : > { %226 = sbr.rel (%p223_p10) target bundleno = 264 (0x108), region = 40  ;;  %520 = vmatprep.subr.bf16.mxu0 (!%p223_p10), %v675_v0  ;;  %528 = vmatprep.subr.bf16.mxu1 (!%p223_p10), %v675_v0  ;;  %v677_v2 = vmov (!%p223_p10), 0   ;;  %vm296_vm2 = vcmask (!%p223_p10), 1046528   ;;  %v274_v4 = vld [vmem:[%s833_s0] sm:$0x1] (!%p223_p10)  ;;  %vm340_vm3 = vcmask (!%p223_p10), 15360  }
  0x10   : > { %530 = vmatprep.mubr.msk.bf16.mxu1 (!%p223_p10), %vm676_vm0, %v675_v0  ;;  %524 = vmatprep.mubr.msk.bf16.mxu0 (!%p223_p10), %vm676_vm0, %v675_v0  ;;  %v276_v9 = vld [vmem:[%s834_s1] sm:$0x1] (!%p223_p10)  ;;  %vm292_vm4 = vcmask (!%p223_p10), 244736   ;;  %s256_s29 = sand.u32 (!%p223_p10), 1, %s657_s19   ;;  %s511_s8 = sshll.u32 (!%p223_p10), %s665_s21, 5  ;;  %vm395_vm5 = vcmask (!%p223_p10), 517120  }
  0x11   : > { %592 = vset.pattern.permute.xlu0 (!%p223_p10), %v677_v2  ;;  %s678_s15 = smov (!%p223_p10), [#allocation2]  }
  0x12   : > { %391 = vperm.xlu0 (!%p223_p10), %592, %v388_v1  }
  0x16   : > { %s260_s7 = scalar_select %p259_p11, %s665_s21, 1 }
  0x17   : > { %s398_s21 = scalar_lea.sflag [#allocation3], %s256_s29 }
  0x18   : > { %s514_s10 = sshll.u32 %s260_s7, 4  ;;  %s264_s13 = scalar_lea.vmem %s836_s3, %s260_s7 }
  0x19   : > { %s272_s16 = scalar_lea.vmem %s837_s4, %s514_s10  ;;  %v275_v3 = vld [vmem:[%s264_s13] sm:$0x1]  ;;  %s503_s7 = sshll.u32 %s256_s29, 1 }
  0x1a   : > { %v593_v5 = vld [vmem:[%s272_s16] sm:$0xff]   ;;  %v346_v6 = vsel %vm344_vm1, %v275_v3, 0  ;;  %v594_v7 = vld [vmem:[%s272_s16 + $0x8] sm:$0x7f]   ;;  %s258_s9 = scalar_lea.vmem [#allocation2], %s503_s7  ;;  %s786_s13 = scalar_lea.hbm %s838_s5, %s511_s8 }
  0x1b   : > { %529 = vmatpush3.bf16.msra.mxu1 %v346_v6  ;;  %521 = vmatpush3.bf16.msra.mxu0 %v593_v5  ;;  %v298_v8 = vsel %vm296_vm2, %v594_v7, 0  ;;  %s412_s10 = sshll.u32 %s258_s9, 4  ;;  %s599_s16 = sshll.u32 %s678_s15, 4  ;;  %s788_s10 = int_to_ptr.vmem [resolvable:$true] %s412_s10  ;;  %s600_s16 = int_to_ptr.vmem [resolvable:$false] %s599_s16 }
  0x1c   : > { %522 = vmatprep.subr.bf16.mxu0 %v675_v0  ;;  %s595_s14 = scalar_lea.vmem %s788_s10, 32  ;;  %s601_s17 = scalar_lea.vmem %s600_s16, 64 }
  0x1d   : > { %p596_p12 = scmp.ne.s32.totalorder %s788_s10, %s595_s14  ;;  %p602_p1 = scmp.lt.s32.totalorder %s788_s10, %s600_s16 }
  0x1e   : > { %531 = vmatmul.mubr.msk.bf16.vlgmr.msra.gmra.mrb[0].mxu1 %vm340_vm3, %v274_v4  ;;  %p603_p2 = scmp.lt.s32.totalorder %s601_s17, %s595_s14 }
  0x1f   : > { %523 = vmatpush3.bf16.msra.mxu0 %v298_v8  ;;  %p597_p13 = pnand %p596_p12, %p749_p4 }
  0x20   : > { %p604_p3 = por %p603_p2, %p602_p1 }
  0x21   : > { %p598_p0 = pneg %p597_p13 }
  0x22   : > { %525 = vmatmul.mubr.msk.bf16.vlgmr.msra.gmra.mrb[0].mxu0 %vm292_vm4, %v276_v9 }
  0x23   : > { %p605_p5 = pnand %p604_p3, %p598_p0 }
  0x91   : > { %v392_v15 = vpop.permute.xlu0 %391 }
  0xf1   : > { %v382_v10 = vpop.f32.mrb[0].mxu1 }
  0xf2   : > { %v532_v11 = vpop.f32.mrb[1].mxu1 }
  0xf3   : > { %v385_v12 = vpop.f32.mrb[2].mxu1 }
  0xf4   : > { %v533_v13 = vpop.f32.mrb[3].mxu1 }
  0xf5   : > { %v334_v14 = vpop.f32.mrb[0].mxu0 }
  0xf6   : > { %v383_v16 = vadd.f32 %v382_v10, %v334_v14  ;;  %v526_v17 = vpop.f32.mrb[1].mxu0 }
  0xf7   : > { %v337_v18 = vpop.f32.mrb[2].mxu0 }
  0xf8   : > { %v394_v19 = vadd.f32 %v392_v15, %v383_v16  ;;  %v527_v20 = vpop.f32.mrb[3].mxu0 }
  0xfa   : > { %396 = vst.msk [vmem:[%s258_s9] sm:$0x3] %vm395_vm5, %v394_v19 }
  0xfb   : > { %608 = shalt.err (!%p605_p5)
}
  0xfc   : > { %s609_s24 = scalar_lea.hbm %s786_s13, 32  ;;  %s613_s29 = scalar_lea.hbm %s838_s5, 64 }
  0xfd   : > { %p610_p6 = scmp.ne.s32.totalorder %s786_s13, %s609_s24  ;;  %p614_p10 = scmp.lt.u32.totalorder %s786_s13, %s838_s5 }
  0xfe   : > { %p615_p11 = scmp.lt.u32.totalorder %s613_s29, %s609_s24  ;;  %p617_p13 = scmp.lt.u32.totalorder %s609_s24, %s786_s13 }
  0xff   : > { %p611_p7 = pnand %p610_p6, %p749_p4 }
 0x100   : > { %p616_p12 = por %p615_p11, %p614_p10 }
 0x101   : > { %p612_p9 = pneg %p611_p7 }
 0x102   : > { %p618_p0 = por %p617_p13, %p616_p12 }
 0x104   : > { %p619_p1 = pnand %p618_p0, %p612_p9 }
 0x106   : > { %622 = shalt.err (!%p619_p1)
}
 0x107   : > { %534 = dma.vmem_to_hbm [thread:$0]  (%p749_p4), %s788_s10, 32, %s786_s13, %s398_s21  }
 0x108 PF: > { %p540_p2 = scmp.ge.s32.totalorder %s673_s23, 2  ;;  %s424_s9 = sand.u32 1, %s653_s18  }
 0x109   : > { %s425_s11 = scalar_lea.sflag [#allocation3], %s424_s9 }
 0x10a   : > { %p537_p3 = pnand %p540_p2, %p756_p8 }
 0x10c   : > { %648 = dma.done.wait (!%p537_p3), %s425_s11, 32  }
 0x10d   : > { %650 = vsyncadd (!%p537_p3), %s425_s11, 4294967264  ;;  %s18_s23 = sadd.s32 1, %s673_s23   ;;  %s841_s18 = smov %s657_s19 }
 0x10e   : > { %p15_p5 = scmp.ge.s32.totalorder %s18_s23, 4   ;;  %s842_s19 = smov %s661_s20 }
 0x10f   : > { %s843_s20 = smov %s762_s6  ;;  %s844_s21 = smov %s669_s22 }
 0x110   : > { %s845_s22 = smov %s847_s26  ;;  %17 = sbr.rel (!%p15_p5) target bundleno = 4 (0x4), region = 78 }
 0x117   :  { %430 = vsyncpa [#allocation3], 1 }
 0x118   :  { %432 = vsyncpa [#allocation3 + $0x1], 1 }

</bundles_post_ra>
